<compile_context>
chip_gen: v7x
topology: tpu7x:2x2x1
jax: 0.10.0
libtpu: 0.0.40
codegen_flags: <defaults>
</compile_context>

<pallas_src>
import functools
import math

import jax
import jax.numpy as jnp
from jax import lax
from jax.experimental import pallas as pl
from jax.experimental.pallas import tpu as pltpu


# ------------------------------------------------------------------ kernel ---
def _fused_mha_kernel(q_ref, k_ref, v_ref,
                      w_in_ref, b_in_ref, w_out_ref, b_out_ref,
                      o_ref, *, num_heads, scale):
    """One batch element per grid step: full MHA forward in VMEM."""
    S = q_ref.shape[1]
    E = q_ref.shape[2]
    H = num_heads
    D = E // H

    # Contract last dims of both operands: x (S,E) . w (O,E) -> x @ w^T (S,O).
    dn = (((1,), (1,)), ((), ()))

    xq = q_ref[0].astype(jnp.float32)            # (S, E)
    xk = k_ref[0].astype(jnp.float32)            # (S, E)
    xv = v_ref[0].astype(jnp.float32)            # (S, E)

    w_in = w_in_ref[...]                         # (3E, E)
    b_in = b_in_ref[...]                         # (1, 3E)

    # Input projections (MXU, f32 accumulation).
    # TODO(synk): for v6e/v7x BERT-scale shapes, cast operands to bf16 here
    # (keep preferred_element_type=f32); kept f32 at toy sizes for exactness.
    q = lax.dot_general(xq, w_in[0:E, :], dn,
                        preferred_element_type=jnp.float32) + b_in[:, 0:E]
    k = lax.dot_general(xk, w_in[E:2 * E, :], dn,
                        preferred_element_type=jnp.float32) + b_in[:, E:2 * E]
    v = lax.dot_general(xv, w_in[2 * E:3 * E, :], dn,
                        preferred_element_type=jnp.float32) + b_in[:, 2 * E:3 * E]

    # Per-head scaled dot-product attention.  Heads are static lane slices of
    # the (S, E) activations, so no 3-D transposes / head split-merge copies.
    # TODO(synk): for large S, tile the (S,S) score matrix flash-style.
    head_outs = []
    for h in range(H):
        lo = h * D
        qh = q[:, lo:lo + D]                     # (S, D)
        kh = k[:, lo:lo + D]                     # (S, D)
        vh = v[:, lo:lo + D]                     # (S, D)
        s = lax.dot_general(qh, kh, dn,
                            preferred_element_type=jnp.float32) * scale  # (S, S)
        m = jnp.max(s, axis=-1, keepdims=True)
        p = jnp.exp(s - m)
        denom = jnp.sum(p, axis=-1, keepdims=True)
        p = p * pl.reciprocal(denom, approx=True)
        head_outs.append(jnp.dot(p, vh, preferred_element_type=jnp.float32))
    ctx = jnp.concatenate(head_outs, axis=-1)    # (S, E), lane-dense

    # Output projection + bias, lane-dense (S, E) store.
    out = lax.dot_general(ctx, w_out_ref[...], dn,
                          preferred_element_type=jnp.float32) + b_out_ref[...]
    o_ref[0] = out.astype(o_ref.dtype)


# ----------------------------------------------------------------- wrapper ---
def pallas_mha(query, key, value, params, num_heads):
    """nn.MultiheadAttention forward (batch_first=True, eval / no dropout)."""
    B, S, E = query.shape
    H = num_heads
    D = E // H
    scale = 1.0 / math.sqrt(D)

    w_in = params["in_proj_weight"]              # (3E, E)
    b_in = params["in_proj_bias"].reshape(1, 3 * E)
    w_out = params["out_proj_weight"]            # (E, E)
    b_out = params["out_proj_bias"].reshape(1, E)

    kernel = functools.partial(_fused_mha_kernel, num_heads=H, scale=scale)

    return pl.pallas_call(
        kernel,
        out_shape=jax.ShapeDtypeStruct((B, S, E), query.dtype),
        grid_spec=pltpu.PrefetchScalarGridSpec(
            num_scalar_prefetch=0,
            grid=(B,),
            in_specs=[
                pl.BlockSpec((1, S, E), lambda b: (b, 0, 0)),     # query
                pl.BlockSpec((1, S, E), lambda b: (b, 0, 0)),     # key
                pl.BlockSpec((1, S, E), lambda b: (b, 0, 0)),     # value
                pl.BlockSpec((3 * E, E), lambda b: (0, 0)),       # in_proj_weight
                pl.BlockSpec((1, 3 * E), lambda b: (0, 0)),       # in_proj_bias
                pl.BlockSpec((E, E), lambda b: (0, 0)),           # out_proj_weight
                pl.BlockSpec((1, E), lambda b: (0, 0)),           # out_proj_bias
            ],
            out_specs=pl.BlockSpec((1, S, E), lambda b: (b, 0, 0)),
        ),
        compiler_params=pltpu.CompilerParams(
            dimension_semantics=("parallel",)),
    )(query, key, value, w_in, b_in, w_out, b_out)


# -------------------------------------------------------------------- main ---
if __name__ == "__main__":
    # config: intermediate_size=32, num_heads=4, attn_dropout (eval => no-op)
    E = 32          # embed_dim == config.intermediate_size
    H = 4           # config.num_heads
    B = 2           # batch
    S = 8           # sequence length

    key0 = jax.random.PRNGKey(0)
    k_q, k_k, k_v, k_w1, k_b1, k_w2, k_b2 = jax.random.split(key0, 7)

    query = jax.random.normal(k_q, (B, S, E), dtype=jnp.float32)
    key_t = jax.random.normal(k_k, (B, S, E), dtype=jnp.float32)
    value = jax.random.normal(k_v, (B, S, E), dtype=jnp.float32)

    # Deterministic synthetic parameters (shapes match nn.MultiheadAttention).
    params = {
        "in_proj_weight": 0.05 * jax.random.normal(k_w1, (3 * E, E), jnp.float32),
        "in_proj_bias":   0.05 * jax.random.normal(k_b1, (3 * E,), jnp.float32),
        "out_proj_weight": 0.05 * jax.random.normal(k_w2, (E, E), jnp.float32),
        "out_proj_bias":   0.05 * jax.random.normal(k_b2, (E,), jnp.float32),
    }
    # TODO(synk): attn_mask / key_padding_mask are not part of this forward;
    # attn_dropout is a no-op in eval mode, so both are omitted.

    out = pallas_mha(query, key_t, value, params, num_heads=H)
    jax.block_until_ready(out)

    # Sanity check against a pure-JAX reference of the same math.
    D = E // H
    q = query.reshape(B * S, E) @ params["in_proj_weight"][:E].T + params["in_proj_bias"][:E]
    k = key_t.reshape(B * S, E) @ params["in_proj_weight"][E:2 * E].T + params["in_proj_bias"][E:2 * E]
    v = value.reshape(B * S, E) @ params["in_proj_weight"][2 * E:].T + params["in_proj_bias"][2 * E:]
    sp = lambda t: t.reshape(B, S, H, D).transpose(0, 2, 1, 3)
    s = jnp.einsum("bhqd,bhkd->bhqk", sp(q), sp(k)) / math.sqrt(D)
    p = jax.nn.softmax(s, axis=-1)
    ref = jnp.einsum("bhqk,bhkd->bhqd", p, sp(v)).transpose(0, 2, 1, 3).reshape(B * S, E)
    ref = (ref @ params["out_proj_weight"].T + params["out_proj_bias"]).reshape(B, S, E)
    assert jnp.allclose(out, ref, atol=5e-4, rtol=5e-4), "mismatch vs reference"

    print("KERNEL_OK")
</pallas_src>

<mosaic_0001>
module attributes {stable_mosaic.version = 11 : i64} {
  func.func @_fused_mha_kernel(%arg0: i32, %arg1: memref<1x8x32xf32, #tpu.memory_space<vmem>>, %arg2: memref<1x8x32xf32, #tpu.memory_space<vmem>>, %arg3: memref<1x8x32xf32, #tpu.memory_space<vmem>>, %arg4: memref<96x32xf32, #tpu.memory_space<vmem>>, %arg5: memref<1x96xf32, #tpu.memory_space<vmem>>, %arg6: memref<32x32xf32, #tpu.memory_space<vmem>>, %arg7: memref<1x32xf32, #tpu.memory_space<vmem>>, %arg8: memref<1x8x32xf32, #tpu.memory_space<vmem>>) attributes {dimension_semantics = [#tpu.dimension_semantics<parallel>], iteration_bounds = array<i64: 2>, scalar_prefetch = 0 : i64, scratch_operands = 0 : i64, tpu.core_type = #tpu.core_type<tc>, window_params = [{transform_indices = @transform_0, window_bounds = array<i64: 1, 8, 32>}, {transform_indices = @transform_1, window_bounds = array<i64: 1, 8, 32>}, {transform_indices = @transform_2, window_bounds = array<i64: 1, 8, 32>}, {pipeline_mode = #tpu.pipeline_mode<synchronous>, transform_indices = @transform_3, window_bounds = array<i64: 96, 32>}, {pipeline_mode = #tpu.pipeline_mode<synchronous>, transform_indices = @transform_4, window_bounds = array<i64: 1, 96>}, {pipeline_mode = #tpu.pipeline_mode<synchronous>, transform_indices = @transform_5, window_bounds = array<i64: 32, 32>}, {pipeline_mode = #tpu.pipeline_mode<synchronous>, transform_indices = @transform_6, window_bounds = array<i64: 1, 32>}, {transform_indices = @transform_7, window_bounds = array<i64: 1, 8, 32>}]} {
    %c0 = arith.constant 0 : index
    %c0_0 = arith.constant 0 : index
    %c0_1 = arith.constant 0 : index
    %0 = vector.load %arg1[%c0, %c0_0, %c0_1] : memref<1x8x32xf32, #tpu.memory_space<vmem>>, vector<1x8x32xf32>
    %1 = vector.shape_cast %0 : vector<1x8x32xf32> to vector<8x32xf32>
    %c0_2 = arith.constant 0 : index
    %c0_3 = arith.constant 0 : index
    %c0_4 = arith.constant 0 : index
    %2 = vector.load %arg2[%c0_2, %c0_3, %c0_4] : memref<1x8x32xf32, #tpu.memory_space<vmem>>, vector<1x8x32xf32>
    %3 = vector.shape_cast %2 : vector<1x8x32xf32> to vector<8x32xf32>
    %c0_5 = arith.constant 0 : index
    %c0_6 = arith.constant 0 : index
    %c0_7 = arith.constant 0 : index
    %4 = vector.load %arg3[%c0_5, %c0_6, %c0_7] : memref<1x8x32xf32, #tpu.memory_space<vmem>>, vector<1x8x32xf32>
    %5 = vector.shape_cast %4 : vector<1x8x32xf32> to vector<8x32xf32>
    %c0_8 = arith.constant 0 : index
    %c0_9 = arith.constant 0 : index
    %6 = vector.load %arg4[%c0_8, %c0_9] : memref<96x32xf32, #tpu.memory_space<vmem>>, vector<96x32xf32>
    %c0_10 = arith.constant 0 : index
    %c0_11 = arith.constant 0 : index
    %7 = vector.load %arg5[%c0_10, %c0_11] : memref<1x96xf32, #tpu.memory_space<vmem>>, vector<1x96xf32>
    %8 = vector.extract_strided_slice %6 {offsets = [0, 0], sizes = [32, 32], strides = [1, 1]} : vector<96x32xf32> to vector<32x32xf32>
    %cst = arith.constant dense<0.000000e+00> : vector<8x32xf32>
    %9 = tpu.matmul %1, %8, %cst {dimension_numbers = #tpu.dot_dimension_numbers<[1], [1], [0], [0], [0, 0, 1, 0], [], []>} : vector<8x32xf32>, vector<32x32xf32>, vector<8x32xf32> -> vector<8x32xf32>
    %10 = vector.extract_strided_slice %7 {offsets = [0, 0], sizes = [1, 32], strides = [1, 1]} : vector<1x96xf32> to vector<1x32xf32>
    %11 = vector.broadcast %10 : vector<1x32xf32> to vector<8x32xf32>
    %12 = arith.addf %9, %11 : vector<8x32xf32>
    %13 = vector.extract_strided_slice %6 {offsets = [32, 0], sizes = [32, 32], strides = [1, 1]} : vector<96x32xf32> to vector<32x32xf32>
    %cst_12 = arith.constant dense<0.000000e+00> : vector<8x32xf32>
    %14 = tpu.matmul %3, %13, %cst_12 {dimension_numbers = #tpu.dot_dimension_numbers<[1], [1], [0], [0], [0, 0, 1, 0], [], []>} : vector<8x32xf32>, vector<32x32xf32>, vector<8x32xf32> -> vector<8x32xf32>
    %15 = vector.extract_strided_slice %7 {offsets = [0, 32], sizes = [1, 32], strides = [1, 1]} : vector<1x96xf32> to vector<1x32xf32>
    %16 = vector.broadcast %15 : vector<1x32xf32> to vector<8x32xf32>
    %17 = arith.addf %14, %16 : vector<8x32xf32>
    %18 = vector.extract_strided_slice %6 {offsets = [64, 0], sizes = [32, 32], strides = [1, 1]} : vector<96x32xf32> to vector<32x32xf32>
    %cst_13 = arith.constant dense<0.000000e+00> : vector<8x32xf32>
    %19 = tpu.matmul %5, %18, %cst_13 {dimension_numbers = #tpu.dot_dimension_numbers<[1], [1], [0], [0], [0, 0, 1, 0], [], []>} : vector<8x32xf32>, vector<32x32xf32>, vector<8x32xf32> -> vector<8x32xf32>
    %20 = vector.extract_strided_slice %7 {offsets = [0, 64], sizes = [1, 32], strides = [1, 1]} : vector<1x96xf32> to vector<1x32xf32>
    %21 = vector.broadcast %20 : vector<1x32xf32> to vector<8x32xf32>
    %22 = arith.addf %19, %21 : vector<8x32xf32>
    %23 = vector.extract_strided_slice %12 {offsets = [0, 0], sizes = [8, 8], strides = [1, 1]} : vector<8x32xf32> to vector<8x8xf32>
    %24 = vector.extract_strided_slice %17 {offsets = [0, 0], sizes = [8, 8], strides = [1, 1]} : vector<8x32xf32> to vector<8x8xf32>
    %25 = vector.extract_strided_slice %22 {offsets = [0, 0], sizes = [8, 8], strides = [1, 1]} : vector<8x32xf32> to vector<8x8xf32>
    %cst_14 = arith.constant dense<0.000000e+00> : vector<8x8xf32>
    %26 = tpu.matmul %23, %24, %cst_14 {dimension_numbers = #tpu.dot_dimension_numbers<[1], [1], [0], [0], [0, 0, 1, 0], [], []>} : vector<8x8xf32>, vector<8x8xf32>, vector<8x8xf32> -> vector<8x8xf32>
    %cst_15 = arith.constant 0.353553385 : f32
    %27 = vector.broadcast %cst_15 : f32 to vector<8x8xf32>
    %28 = arith.mulf %26, %27 : vector<8x8xf32>
    %cst_16 = arith.constant dense<0xFF800000> : vector<8xf32>
    %29 = vector.multi_reduction <maximumf>, %28, %cst_16 [1] : vector<8x8xf32> to vector<8xf32>
    %30 = vector.shape_cast %29 : vector<8xf32> to vector<8x1xf32>
    %31 = vector.broadcast %30 : vector<8x1xf32> to vector<8x8xf32>
    %32 = arith.subf %28, %31 : vector<8x8xf32>
    %33 = math.exp %32 : vector<8x8xf32>
    %cst_17 = arith.constant dense<0.000000e+00> : vector<8xf32>
    %34 = vector.multi_reduction <add>, %33, %cst_17 [1] : vector<8x8xf32> to vector<8xf32>
    %35 = vector.shape_cast %34 : vector<8xf32> to vector<8x1xf32>
    %36 = tpu.reciprocal %35 {approx = true} : vector<8x1xf32> -> vector<8x1xf32>
    %37 = vector.broadcast %36 : vector<8x1xf32> to vector<8x8xf32>
    %38 = arith.mulf %33, %37 : vector<8x8xf32>
    %cst_18 = arith.constant dense<0.000000e+00> : vector<8x8xf32>
    %39 = tpu.matmul %38, %25, %cst_18 {dimension_numbers = #tpu.dot_dimension_numbers<[1], [0], [0], [1], [0, 0, 1, 1], [], []>} : vector<8x8xf32>, vector<8x8xf32>, vector<8x8xf32> -> vector<8x8xf32>
    %40 = vector.extract_strided_slice %12 {offsets = [0, 8], sizes = [8, 8], strides = [1, 1]} : vector<8x32xf32> to vector<8x8xf32>
    %41 = vector.extract_strided_slice %17 {offsets = [0, 8], sizes = [8, 8], strides = [1, 1]} : vector<8x32xf32> to vector<8x8xf32>
    %42 = vector.extract_strided_slice %22 {offsets = [0, 8], sizes = [8, 8], strides = [1, 1]} : vector<8x32xf32> to vector<8x8xf32>
    %cst_19 = arith.constant dense<0.000000e+00> : vector<8x8xf32>
    %43 = tpu.matmul %40, %41, %cst_19 {dimension_numbers = #tpu.dot_dimension_numbers<[1], [1], [0], [0], [0, 0, 1, 0], [], []>} : vector<8x8xf32>, vector<8x8xf32>, vector<8x8xf32> -> vector<8x8xf32>
    %cst_20 = arith.constant 0.353553385 : f32
    %44 = vector.broadcast %cst_20 : f32 to vector<8x8xf32>
    %45 = arith.mulf %43, %44 : vector<8x8xf32>
    %cst_21 = arith.constant dense<0xFF800000> : vector<8xf32>
    %46 = vector.multi_reduction <maximumf>, %45, %cst_21 [1] : vector<8x8xf32> to vector<8xf32>
    %47 = vector.shape_cast %46 : vector<8xf32> to vector<8x1xf32>
    %48 = vector.broadcast %47 : vector<8x1xf32> to vector<8x8xf32>
    %49 = arith.subf %45, %48 : vector<8x8xf32>
    %50 = math.exp %49 : vector<8x8xf32>
    %cst_22 = arith.constant dense<0.000000e+00> : vector<8xf32>
    %51 = vector.multi_reduction <add>, %50, %cst_22 [1] : vector<8x8xf32> to vector<8xf32>
    %52 = vector.shape_cast %51 : vector<8xf32> to vector<8x1xf32>
    %53 = tpu.reciprocal %52 {approx = true} : vector<8x1xf32> -> vector<8x1xf32>
    %54 = vector.broadcast %53 : vector<8x1xf32> to vector<8x8xf32>
    %55 = arith.mulf %50, %54 : vector<8x8xf32>
    %cst_23 = arith.constant dense<0.000000e+00> : vector<8x8xf32>
    %56 = tpu.matmul %55, %42, %cst_23 {dimension_numbers = #tpu.dot_dimension_numbers<[1], [0], [0], [1], [0, 0, 1, 1], [], []>} : vector<8x8xf32>, vector<8x8xf32>, vector<8x8xf32> -> vector<8x8xf32>
    %57 = vector.extract_strided_slice %12 {offsets = [0, 16], sizes = [8, 8], strides = [1, 1]} : vector<8x32xf32> to vector<8x8xf32>
    %58 = vector.extract_strided_slice %17 {offsets = [0, 16], sizes = [8, 8], strides = [1, 1]} : vector<8x32xf32> to vector<8x8xf32>
    %59 = vector.extract_strided_slice %22 {offsets = [0, 16], sizes = [8, 8], strides = [1, 1]} : vector<8x32xf32> to vector<8x8xf32>
    %cst_24 = arith.constant dense<0.000000e+00> : vector<8x8xf32>
    %60 = tpu.matmul %57, %58, %cst_24 {dimension_numbers = #tpu.dot_dimension_numbers<[1], [1], [0], [0], [0, 0, 1, 0], [], []>} : vector<8x8xf32>, vector<8x8xf32>, vector<8x8xf32> -> vector<8x8xf32>
    %cst_25 = arith.constant 0.353553385 : f32
    %61 = vector.broadcast %cst_25 : f32 to vector<8x8xf32>
    %62 = arith.mulf %60, %61 : vector<8x8xf32>
    %cst_26 = arith.constant dense<0xFF800000> : vector<8xf32>
    %63 = vector.multi_reduction <maximumf>, %62, %cst_26 [1] : vector<8x8xf32> to vector<8xf32>
    %64 = vector.shape_cast %63 : vector<8xf32> to vector<8x1xf32>
    %65 = vector.broadcast %64 : vector<8x1xf32> to vector<8x8xf32>
    %66 = arith.subf %62, %65 : vector<8x8xf32>
    %67 = math.exp %66 : vector<8x8xf32>
    %cst_27 = arith.constant dense<0.000000e+00> : vector<8xf32>
    %68 = vector.multi_reduction <add>, %67, %cst_27 [1] : vector<8x8xf32> to vector<8xf32>
    %69 = vector.shape_cast %68 : vector<8xf32> to vector<8x1xf32>
    %70 = tpu.reciprocal %69 {approx = true} : vector<8x1xf32> -> vector<8x1xf32>
    %71 = vector.broadcast %70 : vector<8x1xf32> to vector<8x8xf32>
    %72 = arith.mulf %67, %71 : vector<8x8xf32>
    %cst_28 = arith.constant dense<0.000000e+00> : vector<8x8xf32>
    %73 = tpu.matmul %72, %59, %cst_28 {dimension_numbers = #tpu.dot_dimension_numbers<[1], [0], [0], [1], [0, 0, 1, 1], [], []>} : vector<8x8xf32>, vector<8x8xf32>, vector<8x8xf32> -> vector<8x8xf32>
    %74 = vector.extract_strided_slice %12 {offsets = [0, 24], sizes = [8, 8], strides = [1, 1]} : vector<8x32xf32> to vector<8x8xf32>
    %75 = vector.extract_strided_slice %17 {offsets = [0, 24], sizes = [8, 8], strides = [1, 1]} : vector<8x32xf32> to vector<8x8xf32>
    %76 = vector.extract_strided_slice %22 {offsets = [0, 24], sizes = [8, 8], strides = [1, 1]} : vector<8x32xf32> to vector<8x8xf32>
    %cst_29 = arith.constant dense<0.000000e+00> : vector<8x8xf32>
    %77 = tpu.matmul %74, %75, %cst_29 {dimension_numbers = #tpu.dot_dimension_numbers<[1], [1], [0], [0], [0, 0, 1, 0], [], []>} : vector<8x8xf32>, vector<8x8xf32>, vector<8x8xf32> -> vector<8x8xf32>
    %cst_30 = arith.constant 0.353553385 : f32
    %78 = vector.broadcast %cst_30 : f32 to vector<8x8xf32>
    %79 = arith.mulf %77, %78 : vector<8x8xf32>
    %cst_31 = arith.constant dense<0xFF800000> : vector<8xf32>
    %80 = vector.multi_reduction <maximumf>, %79, %cst_31 [1] : vector<8x8xf32> to vector<8xf32>
    %81 = vector.shape_cast %80 : vector<8xf32> to vector<8x1xf32>
    %82 = vector.broadcast %81 : vector<8x1xf32> to vector<8x8xf32>
    %83 = arith.subf %79, %82 : vector<8x8xf32>
    %84 = math.exp %83 : vector<8x8xf32>
    %cst_32 = arith.constant dense<0.000000e+00> : vector<8xf32>
    %85 = vector.multi_reduction <add>, %84, %cst_32 [1] : vector<8x8xf32> to vector<8xf32>
    %86 = vector.shape_cast %85 : vector<8xf32> to vector<8x1xf32>
    %87 = tpu.reciprocal %86 {approx = true} : vector<8x1xf32> -> vector<8x1xf32>
    %88 = vector.broadcast %87 : vector<8x1xf32> to vector<8x8xf32>
    %89 = arith.mulf %84, %88 : vector<8x8xf32>
    %cst_33 = arith.constant dense<0.000000e+00> : vector<8x8xf32>
    %90 = tpu.matmul %89, %76, %cst_33 {dimension_numbers = #tpu.dot_dimension_numbers<[1], [0], [0], [1], [0, 0, 1, 1], [], []>} : vector<8x8xf32>, vector<8x8xf32>, vector<8x8xf32> -> vector<8x8xf32>
    %91 = tpu.concatenate %39, %56, %73, %90 in 1 : vector<8x8xf32>, vector<8x8xf32>, vector<8x8xf32>, vector<8x8xf32> -> vector<8x32xf32>
    %c0_34 = arith.constant 0 : index
    %c0_35 = arith.constant 0 : index
    %92 = vector.load %arg6[%c0_34, %c0_35] : memref<32x32xf32, #tpu.memory_space<vmem>>, vector<32x32xf32>
    %cst_36 = arith.constant dense<0.000000e+00> : vector<8x32xf32>
    %93 = tpu.matmul %91, %92, %cst_36 {dimension_numbers = #tpu.dot_dimension_numbers<[1], [1], [0], [0], [0, 0, 1, 0], [], []>} : vector<8x32xf32>, vector<32x32xf32>, vector<8x32xf32> -> vector<8x32xf32>
    %c0_37 = arith.constant 0 : index
    %c0_38 = arith.constant 0 : index
    %94 = vector.load %arg7[%c0_37, %c0_38] : memref<1x32xf32, #tpu.memory_space<vmem>>, vector<1x32xf32>
    %95 = vector.broadcast %94 : vector<1x32xf32> to vector<8x32xf32>
    %96 = arith.addf %93, %95 : vector<8x32xf32>
    %c0_39 = arith.constant 0 : index
    %c0_40 = arith.constant 0 : index
    %c0_41 = arith.constant 0 : index
    %97 = vector.load %arg8[%c0_39, %c0_40, %c0_41] : memref<1x8x32xf32, #tpu.memory_space<vmem>>, vector<1x8x32xf32>
    %98 = vector.shape_cast %97 : vector<1x8x32xf32> to vector<8x32xf32>
    %99 = vector.shape_cast %96 : vector<8x32xf32> to vector<1x8x32xf32>
    tpu.vector_store %arg8[%c0_39, %c0_40, %c0_41], %99 {strides = array<i32>} : memref<1x8x32xf32, #tpu.memory_space<vmem>>, vector<1x8x32xf32>,
    return
  }
  func.func @transform_0(%arg0: i32) -> (i32, i32, i32) {
    %c0_i32 = arith.constant 0 : i32
    %c0_i32_0 = arith.constant 0 : i32
    %c0_i32_1 = arith.constant 0 : i32
    return %arg0, %c0_i32, %c0_i32_0 : i32, i32, i32
  }
  func.func @transform_1(%arg0: i32) -> (i32, i32, i32) {
    %c0_i32 = arith.constant 0 : i32
    %c0_i32_0 = arith.constant 0 : i32
    %c0_i32_1 = arith.constant 0 : i32
    return %arg0, %c0_i32, %c0_i32_0 : i32, i32, i32
  }
  func.func @transform_2(%arg0: i32) -> (i32, i32, i32) {
    %c0_i32 = arith.constant 0 : i32
    %c0_i32_0 = arith.constant 0 : i32
    %c0_i32_1 = arith.constant 0 : i32
    return %arg0, %c0_i32, %c0_i32_0 : i32, i32, i32
  }
  func.func @transform_3(%arg0: i32) -> (i32, i32) {
    %c0_i32 = arith.constant 0 : i32
    %c0_i32_0 = arith.constant 0 : i32
    %c0_i32_1 = arith.constant 0 : i32
    return %c0_i32, %c0_i32_0 : i32, i32
  }
  func.func @transform_4(%arg0: i32) -> (i32, i32) {
    %c0_i32 = arith.constant 0 : i32
    %c0_i32_0 = arith.constant 0 : i32
    %c0_i32_1 = arith.constant 0 : i32
    return %c0_i32, %c0_i32_0 : i32, i32
  }
  func.func @transform_5(%arg0: i32) -> (i32, i32) {
    %c0_i32 = arith.constant 0 : i32
    %c0_i32_0 = arith.constant 0 : i32
    %c0_i32_1 = arith.constant 0 : i32
    return %c0_i32, %c0_i32_0 : i32, i32
  }
  func.func @transform_6(%arg0: i32) -> (i32, i32) {
    %c0_i32 = arith.constant 0 : i32
    %c0_i32_0 = arith.constant 0 : i32
    %c0_i32_1 = arith.constant 0 : i32
    return %c0_i32, %c0_i32_0 : i32, i32
  }
  func.func @transform_7(%arg0: i32) -> (i32, i32, i32) {
    %c0_i32 = arith.constant 0 : i32
    %c0_i32_0 = arith.constant 0 : i32
    %c0_i32_1 = arith.constant 0 : i32
    return %arg0, %c0_i32, %c0_i32_0 : i32, i32, i32
  }
}

</mosaic_0001>

<bundles_post_ra>
// kernel: tpu_custom_call.1
= control target key start
LH: loop header
LB: loop body
LE: loop exit
PB: predicated region body
PF: predicated region fallthrough
CT: control target
= control target key end

     0   :  { %12 = vsyncpa [#allocation3], 0  ;;  %s2121_s0 = inlined_call_operand.vmem [shape: f32[2,8,32], index: 0, kind: input, shape index: {}]   ;;  %s2122_s1 = inlined_call_operand.vmem [shape: f32[2,8,32], index: 1, kind: input, shape index: {}]   ;;  %s2123_s2 = inlined_call_operand.vmem [shape: f32[2,8,32], index: 2, kind: input, shape index: {}]   ;;  %s2124_s3 = inlined_call_operand.vmem [shape: f32[96,32], index: 3, kind: input, shape index: {}]   ;;  %s2125_s4 = inlined_call_operand.vmem [shape: f32[1,96], index: 4, kind: input, shape index: {}]   ;;  %s2126_s5 = inlined_call_operand.vmem [shape: f32[32,32], index: 5, kind: input, shape index: {}]   ;;  %s2127_s6 = inlined_call_operand.vmem [shape: f32[1,32], index: 6, kind: input, shape index: {}]   ;;  %s2128_s7 = inlined_call_operand.hbm [shape: f32[2,8,32], index: 7, kind: output, shape index: {}]  }
   0x1   :  { %14 = vsyncpa [#allocation3 + $0x1], 0  ;;  %s1844_s24 = smov 0   ;;  %s1846_s25 = smov 0  }
   0x2   :  { %s1848_s26 = smov 0   ;;  %s1850_s27 = smov 0  }
   0x3 LB: > { %s1865_s28 = sadd.s32 4294967295, %s1790_s27   ;;  %s1464_s29 = sadd.s32 4294967294, %s1790_s27   ;;  %s1790_s27 = sphi %s1850_s27, %s2136_s27   ;;  %s1786_s26 = sphi %s1848_s26, %s2135_s26   ;;  %s1782_s25 = sphi %s1846_s25, %s2134_s25   ;;  %s1778_s24 = sphi %s1844_s24, %s2133_s24  }
   0x4   : > { %s1869_s30 = sadd.s32 1, %s1790_s27   ;;  %s189_s8 = sadd.s32 1, %s1786_s26 }
   0x5   : > { %s186_s9 = ssub.s32 %s1790_s27, %s1869_s30  ;;  %p199_p0 = scmp.ne.s32.totalorder %s1786_s26, %s1782_s25 }
   0x6   : > { %p187_p1 = scmp.eq.s32.totalorder %s186_s9, 0  ;;  %p200_p2 = scmp.eq.s32.totalorder %s1865_s28, 1 }
   0x7   : > { %p205_p3 = scmp.ne.s32.totalorder %s1782_s25, %s1778_s24  ;;  %p206_p4 = scmp.eq.s32.totalorder %s1464_s29, 1 }
   0x8   : > { %s1880_s10 = scalar_select %p187_p1, %s1786_s26, %s189_s8  }
   0x9   : > { %p1882_p5 = por %p200_p2, %p199_p0  ;;  %p1886_p6 = por %p206_p4, %p205_p3 }
   0xa   : > { %p1467_p7 = scmp.ge.s32.totalorder %s1790_s27, 1  ;;  %p257_p8 = scmp.lt.s32.totalorder %s1790_s27, 3 }
   0xc   : > { %p258_p9 = pnand %p1467_p7, %p257_p8 }
   0xd   : > { %v315_v0 = vld [vmem:[%s2124_s3 + $0x20] sm:$0xff] (!%p258_p9)  ;;  %v316_v1 = vld [vmem:[%s2124_s3 + $0x28] sm:$0xff] (!%p258_p9)  ;;  %vm330_vm0 = vcmask (!%p258_p9), 261120   ;;  %v1792_v3 = vmov (!%p258_p9), 0.0|0.0   ;;  %p296_p10 = scmp.lt.s32.totalorder (!%p258_p9), %s1865_s28, 1  ;;  %vm1793_vm2 = vmmov (!%p258_p9), 0  }
   0xe   : > { %261 = sbr.rel (%p258_p9) target bundleno = 2928 (0xb70), region = 48  ;;  %v311_v2 = vld [vmem:[%s2124_s3] sm:$0xff] (!%p258_p9)  ;;  %1638 = vmatprep.subr.bf16.mxu1 (!%p258_p9), %v1792_v3  ;;  %vm1904_vm1 = vmpackc.low (!%p258_p9), %vm330_vm0, %vm330_vm0  ;;  %v1639_v5 = vpack.c.bf16 (!%p258_p9), %v316_v1, %v315_v0  ;;  %1630 = vmatprep.subr.bf16.mxu0 (!%p258_p9), %v1792_v3  ;;  %v312_v6 = vld [vmem:[%s2124_s3 + $0x8] sm:$0xff] (!%p258_p9)  ;;  %v1794_v8 = vmov (!%p258_p9), 0.0   ;;  %s1795_s18 = smov (!%p258_p9), 96   ;;  %vm592_vm3 = vcmask (!%p258_p9), 64512  }
   0xf   : > { %v1631_v7 = vpack.c.bf16 (!%p258_p9), %v312_v6, %v311_v2  ;;  %1565 = vmatprep.mubr.msk.f32.mxu1 (!%p258_p9), %vm1793_vm2, %v1794_v8  ;;  %1554 = vmatprep.mubr.msk.f32.mxu0 (!%p258_p9), %vm1793_vm2, %v1794_v8  ;;  %v1472_v9 = vld [vmem:[%s2125_s4] ss:$0 sm:$0xff] (!%p258_p9)  ;;  %v317_v10 = vld [vmem:[%s2124_s3 + $0x30] sm:$0xff] (!%p258_p9)  ;;  %v318_v11 = vld [vmem:[%s2124_s3 + $0x38] sm:$0xff] (!%p258_p9)  ;;  %s1796_s19 = smov (!%p258_p9), 64   ;;  %s1797_s8 = smov (!%p258_p9), 120  }
  0x10   : > { %1641 = vmatpush3.bf16.xpose.msk.msra.mxu1 (!%p258_p9), %vm1904_vm1, %v1639_v5  ;;  %v313_v12 = vld [vmem:[%s2124_s3 + $0x10] sm:$0xff] (!%p258_p9)  ;;  %v314_v13 = vld [vmem:[%s2124_s3 + $0x18] sm:$0xff] (!%p258_p9)  ;;  %416 = vrot.lane.b32.xlu0 (!%p258_p9), %v1472_v9, %s1795_s18  ;;  %v1643_v14 = vpack.c.bf16 (!%p258_p9), %v318_v11, %v317_v10  ;;  %v319_v18 = vld [vmem:[%s2124_s3 + $0x40] sm:$0xff] (!%p258_p9)  ;;  %s1800_s13 = smov (!%p258_p9), 8   ;;  %s1801_s14 = smov (!%p258_p9), 16   ;;  %vm1266_vm4 = vcmask (!%p258_p9), 130048  }
  0x11   : > { %1633 = vmatpush3.bf16.xpose.msk.msra.mxu0 (!%p258_p9), %vm1904_vm1, %v1631_v7  ;;  %1642 = vmatprep.subr.bf16.mxu1 (!%p258_p9), %v1792_v3  ;;  %v1635_v15 = vpack.c.bf16 (!%p258_p9), %v314_v13, %v313_v12  ;;  %v320_v19 = vld [vmem:[%s2124_s3 + $0x48] sm:$0xff] (!%p258_p9)  ;;  %v321_v21 = vld [vmem:[%s2124_s3 + $0x50] sm:$0xff] (!%p258_p9)  ;;  %v322_v22 = vld [vmem:[%s2124_s3 + $0x58] sm:$0xff] (!%p258_p9)  ;;  %vm1268_vm5 = vcmask (!%p258_p9), 195584  }
  0x12   : > { %1634 = vmatprep.subr.bf16.mxu0 (!%p258_p9), %v1792_v3  ;;  %504 = vrot.lane.b32.xlu1 (!%p258_p9), %v1472_v9, %s1796_s19  ;;  %v1647_v20 = vpack.c.bf16 (!%p258_p9), %v320_v19, %v319_v18  ;;  %v1651_v23 = vpack.c.bf16 (!%p258_p9), %v322_v22, %v321_v21  ;;  %v1500_v4 = vld [vmem:[%s2127_s6] ss:$0 sm:$0xff] (!%p258_p9) }
  0x15   : > { %s297_s17 = scalar_select %p296_p10, %s1865_s28, 1 }
  0x17   : > { %s1469_s20 = sshll.u32 %s297_s17, 3 }
  0x18   : > { %1645 = vmatpush3.bf16.xpose.msk.msra.mxu1 %vm1904_vm1, %v1643_v14  ;;  %s303_s23 = scalar_lea.vmem %s2122_s1, %s1469_s20  ;;  %s299_s9 = scalar_lea.vmem %s2121_s0, %s1469_s20 }
  0x19   : > { %1637 = vmatpush3.bf16.xpose.msk.msra.mxu0 %vm1904_vm1, %v1635_v15  ;;  %1579 = vmatprep.subr.mxu1 %v1794_v8  ;;  %v309_v16 = vld [vmem:[%s303_s23] sm:$0xff]  ;;  %s307_s29 = scalar_lea.vmem %s2123_s2, %s1469_s20  ;;  %s1798_s20 = smov 112  }
  0x1a   : > { %1646 = vmatprep.subr.bf16.mxu0 %v1792_v3  ;;  %v308_v17 = vld [vmem:[%s299_s9] sm:$0xff]  ;;  %s1799_s9 = smov 104  }
  0x1b   : > { %v310_v24 = vld [vmem:[%s307_s29] sm:$0xff]  ;;  %s1802_s29 = smov 24  }
  0x1f   : > { %1566 = vmatmul.mubr.msk.f32.vlgmr.msra.gmra.mrb[0].mxu1 %vm330_vm0, %v309_v16 }
  0x20   : > { %1555 = vmatmul.mubr.msk.f32.vlgmr.msra.gmra.mrb[0].mxu0 %vm330_vm0, %v308_v17  ;;  %1581 = vmatprep.mubr.msk.f32.mxu1 %vm1793_vm2, %v1794_v8 }
  0x21   : > { %1576 = vmatprep.mubr.msk.f32.mxu0 %vm1793_vm2, %v1794_v8  ;;  %1649 = vmatpush3.bf16.xpose.msk.msra.mxu0 %vm1904_vm1, %v1647_v20 }
  0x22   : > { %1650 = vmatprep.subr.bf16.mxu0 %v1792_v3 }
  0x29   : > { %1653 = vmatpush3.bf16.xpose.msk.msra.mxu0 %vm1904_vm1, %v1651_v23 }
  0x2a   : > { %1654 = vmatprep.subr.bf16.mxu0 %v1792_v3 }
  0x30   : > { %1577 = vmatmul.mubr.msk.f32.vlgmr.msra.gmra.mrb[2].mxu0 %vm330_vm0, %v310_v24 }
  0x31   : > { %1627 = vmatprep.mubr.msk.f32.mxu0 %vm1793_vm2, %v1794_v8 }
  0x82   : > { %v417_v25 = vpop.permute.xlu0 %416 }
  0x84   : > { %v505_v32 = vpop.permute.xlu1 %504 }
  0xf2   : > { %v500_v26 = vpop.f32.mrb[0].mxu1 }
  0xf3   : > { %v1983_v27 = vadd.f32 %v500_v26, %v417_v25  ;;  %v1567_v28 = vpop.f32.mrb[1].mxu1  ;;  %v412_v29 = vpop.f32.mrb[0].mxu0 }
  0xf4   : > { %v1985_v30 = vadd.f32 %v1472_v9, %v412_v29  ;;  %v1556_v31 = vpop.f32.mrb[1].mxu0 }
  0xf5   : > { %756 = vrot.lane.b32.xlu1 %v1983_v27, %s1797_s8  ;;  %1580 = vmatpush3.xpose.msk.msra.mxu1 %vm592_vm3, %v1983_v27 }
  0xf6   : > { %1584 = vmatprep.subr.mxu1 %v1794_v8 }
  0xf8   : > { %1582 = vmatmul.mubr.msk.f32.vlgmr.msra.gmra.mrb[2].mxu1 %vm592_vm3, %v1985_v30 }
  0xf9   : > { %1586 = vmatprep.mubr.msk.f32.mxu1 %vm1793_vm2, %v1794_v8 }
 0x103   : > { %v588_v33 = vpop.f32.mrb[2].mxu0 }
 0x104   : > { %v1995_v34 = vadd.f32 %v588_v33, %v505_v32  ;;  %v1578_v35 = vpop.f32.mrb[3].mxu0 }
 0x106   : > { %1585 = vmatpush3.msra.mxu1 %v1995_v34 }
 0x107   : > { %1589 = vmatprep.subr.mxu1 %v1794_v8 }
 0x167   : > { %v757_v45 = vpop.permute.xlu1 %756 }
 0x1cb   : > { %v665_v36 = vpop.f32.mrb[2].mxu1 }
 0x1cc   : > { %v669_v37 = vmul.f32 0.35355338, %v665_v36  ;;  %v1583_v38 = vpop.f32.mrb[3].mxu1 }
 0x1cd   : > { %v1270_v38 = vld [vmem:[%s2126_s5] sm:$0xff] }
 0x1ce   : > { %v670_v39 = vsel %vm592_vm3, %v669_v37, -inf }
 0x1cf   : > { %671 = vmax.xlane.f32.xlu0 %v670_v39 }
 0x1e5   : > { %845 = vrot.lane.b32.xlu0 %v1995_v34, %s1797_s8 }
 0x1e9   : > { %923 = vrot.lane.b32.xlu0 %v1983_v27, %s1798_s20 }
 0x25c   : > { %v672_v40 = vpop.xlane.xlu0 %671 }
 0x25d   : > { %v673_v41 = vsub.f32 %v669_v37, %v672_v40  ;;  %v1272_v40 = vld [vmem:[%s2126_s5 + $0x10] sm:$0xff] }
 0x25f   : > { %v674_v42 = vmul.f32 1.442695, %v673_v41  ;;  %v1273_v41 = vld [vmem:[%s2126_s5 + $0x18] sm:$0xff] }
 0x260   : > { %v846_v50 = vpop.permute.xlu0 %845 }
 0x261   : > { %1712 = vpow2.f32 %v674_v42  ;;  %v1659_v42 = vpack.c.bf16 %v1273_v41, %v1272_v40 }
 0x264   : > { %v924_v62 = vpop.permute.xlu0 %923 }
 0x26b   : > { %v1713_v43 = vpop.eup %1712 }
 0x26c   : > { %v676_v44 = vsel %vm592_vm3, %v1713_v43, 0.0 }
 0x26d   : > { %677 = vadd.xlane.f32.xlu1 %v676_v44 }
 0x27e   : > { %754 = vrot.lane.b32.xlu1 %v1985_v30, %s1797_s8  ;;  %s293_s8 = sand.u32 1, %s1782_s25  }
 0x27f   : > { %s1368_s21 = scalar_lea.sflag [#allocation3], %s293_s8 }
 0x2fa   : > { %v678_v46 = vpop.xlane.xlu1 %677 }
 0x2fb   : > { %1714 = vrcp.f32 %v678_v46 }
 0x2fe   : > { %v755_v49 = vpop.permute.xlu1 %754 }
 0x305   : > { %v1715_v47 = vpop.eup %1714 }
 0x306   : > { %v680_v48 = vmul.f32 %v1715_v47, %v1713_v43 }
 0x308   : > { %1587 = vmatmul.mubr.msk.f32.vlgmr.msra.gmra.mrb[4].mxu1 %vm592_vm3, %v680_v48 }
 0x309   : > { %1590 = vmatpush3.xpose.msk.msra.mxu1 %vm592_vm3, %v757_v45  ;;  %1591 = vmatprep.mubr.msk.f32.mxu1 %vm1793_vm2, %v1794_v8 }
 0x30a   : > { %1594 = vmatprep.subr.mxu1 %v1794_v8 }
 0x30c   : > { %1592 = vmatmul.mubr.msk.f32.vlgmr.msra.gmra.mrb[6].mxu1 %vm592_vm3, %v755_v49 }
 0x30d   : > { %1595 = vmatpush3.msra.mxu1 %v846_v50  ;;  %1596 = vmatprep.mubr.msk.f32.mxu1 %vm1793_vm2, %v1794_v8 }
 0x30e   : > { %1599 = vmatprep.subr.mxu1 %v1794_v8 }
 0x3db   : > { %v2014_v51 = vpop.f32.mrb[4].mxu1 }
 0x3dc   : > { %v1588_v52 = vpop.f32.mrb[5].mxu1 }
 0x3df   : > { %v828_v53 = vpop.f32.mrb[6].mxu1 }
 0x3e0   : > { %v832_v54 = vmul.f32 0.35355338, %v828_v53  ;;  %v1593_v55 = vpop.f32.mrb[7].mxu1 }
 0x3e2   : > { %v833_v56 = vsel %vm592_vm3, %v832_v54, -inf }
 0x3e3   : > { %834 = vmax.xlane.f32.xlu1 %v833_v56 }
 0x470   : > { %v835_v57 = vpop.xlane.xlu1 %834 }
 0x471   : > { %v836_v58 = vsub.f32 %v832_v54, %v835_v57 }
 0x473   : > { %v837_v59 = vmul.f32 1.442695, %v836_v58 }
 0x475   : > { %1716 = vpow2.f32 %v837_v59 }
 0x47f   : > { %v1717_v60 = vpop.eup %1716 }
 0x480   : > { %v839_v61 = vsel %vm592_vm3, %v1717_v60, 0.0 }
 0x481   : > { %840 = vadd.xlane.f32.xlu0 %v839_v61 }
 0x497   : > { %921 = vrot.lane.b32.xlu0 %v1985_v30, %s1798_s20 }
 0x50e   : > { %v841_v63 = vpop.xlane.xlu0 %840 }
 0x50f   : > { %1718 = vrcp.f32 %v841_v63 }
 0x512   : > { %v922_v2 = vpop.permute.xlu0 %921 }
 0x519   : > { %v1719_v0 = vpop.eup %1718 }
 0x51a   : > { %v843_v1 = vmul.f32 %v1719_v0, %v1717_v60 }
 0x51c   : > { %1597 = vmatmul.mubr.msk.f32.vlgmr.msra.gmra.mrb[8].mxu1 %vm592_vm3, %v843_v1 }
 0x51d   : > { %1600 = vmatpush3.xpose.msk.msra.mxu1 %vm592_vm3, %v924_v62  ;;  %1601 = vmatprep.mubr.msk.f32.mxu1 %vm1793_vm2, %v1794_v8 }
 0x51e   : > { %1604 = vmatprep.subr.mxu1 %v1794_v8 }
 0x520   : > { %1602 = vmatmul.mubr.msk.f32.vlgmr.msra.gmra.mrb[10].mxu1 %vm592_vm3, %v922_v2 }
 0x521   : > { %1606 = vmatprep.mubr.msk.f32.mxu1 %vm1793_vm2, %v1794_v8 }
 0x5ef   : > { %v917_v5 = vpop.f32.mrb[8].mxu1 }
 0x5f0   : > { %v1598_v6 = vpop.f32.mrb[9].mxu1 }
 0x5f3   : > { %v995_v7 = vpop.f32.mrb[10].mxu1 }
 0x5f4   : > { %v999_v9 = vmul.f32 0.35355338, %v995_v7  ;;  %v1603_v10 = vpop.f32.mrb[11].mxu1 }
 0x5f6   : > { %v1000_v11 = vsel %vm592_vm3, %v999_v9, -inf }
 0x5f7   : > { %1001 = vmax.xlane.f32.xlu1 %v1000_v11 }
 0x608   : > { %1011 = vrot.lane.b32.xlu1 %v1995_v34, %s1798_s20  ;;  %s1468_s20 = sshll.u32 %s293_s8, 3 }
 0x609   : > { %s295_s15 = scalar_lea.vmem [#allocation2], %s1468_s20 }
 0x60a   : > { %s1381_s16 = sshll.u32 %s295_s15, 4  ;;  %s2080_s16 = int_to_ptr.vmem [resolvable:$true] %s1381_s16 }
 0x60b   : > { %s1728_s22 = scalar_lea.vmem %s2080_s16, 128 }
 0x60c   : > { %1089 = vrot.lane.b32.xlu1 %v1983_v27, %s1799_s9  ;;  %p1729_p11 = scmp.ne.s32.totalorder %s2080_s16, %s1728_s22 }
 0x60e   : > { %p1730_p12 = pnand %p1729_p11, %p1882_p5 }
 0x610   : > { %1087 = vrot.lane.b32.xlu1 %v1985_v30, %s1799_s9  ;;  %p1731_p13 = pneg %p1730_p12 }
 0x684   : > { %v1002_v12 = vpop.xlane.xlu1 %1001 }
 0x685   : > { %v1003_v13 = vsub.f32 %v999_v9, %v1002_v12 }
 0x687   : > { %v1004_v14 = vmul.f32 1.442695, %v1003_v13 }
 0x688   : > { %v1012_v15 = vpop.permute.xlu1 %1011 }
 0x689   : > { %1720 = vpow2.f32 %v1004_v14  ;;  %1605 = vmatpush3.msra.mxu1 %v1012_v15 }
 0x68a   : > { %1609 = vmatprep.subr.mxu1 %v1794_v8 }
 0x68c   : > { %v1090_v20 = vpop.permute.xlu1 %1089 }
 0x690   : > { %v1088_v22 = vpop.permute.xlu1 %1087 }
 0x693   : > { %v1721_v16 = vpop.eup %1720 }
 0x694   : > { %v1006_v17 = vsel %vm592_vm3, %v1721_v16, 0.0 }
 0x695   : > { %1007 = vadd.xlane.f32.xlu0 %v1006_v17 }
 0x722   : > { %v1008_v18 = vpop.xlane.xlu0 %1007 }
 0x723   : > { %1722 = vrcp.f32 %v1008_v18 }
 0x72d   : > { %v1723_v19 = vpop.eup %1722 }
 0x72e   : > { %v1010_v21 = vmul.f32 %v1723_v19, %v1721_v16 }
 0x730   : > { %1607 = vmatmul.mubr.msk.f32.vlgmr.msra.gmra.mrb[12].mxu1 %vm592_vm3, %v1010_v21 }
 0x731   : > { %1610 = vmatpush3.xpose.msk.msra.mxu1 %vm592_vm3, %v1090_v20  ;;  %1611 = vmatprep.mubr.msk.f32.mxu1 %vm1793_vm2, %v1794_v8 }
 0x732   : > { %1614 = vmatprep.subr.mxu1 %v1794_v8 }
 0x734   : > { %1612 = vmatmul.mubr.msk.f32.vlgmr.msra.gmra.mrb[14].mxu1 %vm592_vm3, %v1088_v22 }
 0x735   : > { %1616 = vmatprep.mubr.msk.f32.mxu1 %vm1793_vm2, %v1794_v8 }
 0x803   : > { %v1083_v23 = vpop.f32.mrb[12].mxu1 }
 0x804   : > { %v1608_v24 = vpop.f32.mrb[13].mxu1 }
 0x807   : > { %v1161_v25 = vpop.f32.mrb[14].mxu1 }
 0x808   : > { %v1165_v26 = vmul.f32 0.35355338, %v1161_v25  ;;  %v1613_v27 = vpop.f32.mrb[15].mxu1 }
 0x80a   : > { %v1166_v28 = vsel %vm592_vm3, %v1165_v26, -inf }
 0x80b   : > { %1167 = vmax.xlane.f32.xlu1 %v1166_v28 }
 0x898   : > { %v1168_v29 = vpop.xlane.xlu1 %1167 }
 0x899   : > { %v1169_v30 = vsub.f32 %v1165_v26, %v1168_v29 }
 0x89b   : > { %v1170_v31 = vmul.f32 1.442695, %v1169_v30 }
 0x89d   : > { %1724 = vpow2.f32 %v1170_v31 }
 0x8a7   : > { %v1725_v32 = vpop.eup %1724 }
 0x8a8   : > { %v1172_v33 = vsel %vm592_vm3, %v1725_v32, 0.0 }
 0x8a9   : > { %1173 = vadd.xlane.f32.xlu0 %v1172_v33 }
 0x8bf   : > { %1177 = vrot.lane.b32.xlu0 %v1995_v34, %s1799_s9  ;;  %v1271_v34 = vld [vmem:[%s2126_s5 + $0x8] sm:$0xff] }
 0x8c0   : > { %v1655_v39 = vpack.c.bf16 %v1271_v34, %v1270_v38 }
 0x8c2   : > { %1657 = vmatpush3.bf16.xpose.msk.msra.mxu0 %vm1904_vm1, %v1655_v39 }
 0x8c3   : > { %1254 = vrot.lane.b32.xlu0 %v917_v5, %s1800_s13  ;;  %1658 = vmatprep.subr.bf16.mxu0 %v1792_v3 }
 0x8c7   : > { %1258 = vrot.lane.b32.xlu0 %v1083_v23, %s1801_s14  ;;  %s1507_s14 = sshll.u32 %s1865_s28, 7  ;;  %s1803_s28 = smov [#allocation2]  }
 0x8c8   : > { %s2078_s19 = scalar_lea.hbm %s2128_s7, %s1507_s14  ;;  %s1732_s23 = sshll.u32 %s1803_s28, 4  ;;  %s1733_s23 = int_to_ptr.vmem [resolvable:$false] %s1732_s23 }
 0x8c9   : > { %p1735_p0 = scmp.lt.s32.totalorder %s2080_s16, %s1733_s23 }
 0x8ca   : > { %1661 = vmatpush3.bf16.xpose.msk.msra.mxu0 %vm1904_vm1, %v1659_v42 }
 0x936   : > { %v1174_v8 = vpop.xlane.xlu0 %1173 }
 0x937   : > { %1726 = vrcp.f32 %v1174_v8 }
 0x93a   : > { %v1178_v35 = vpop.permute.xlu0 %1177 }
 0x93b   : > { %1615 = vmatpush3.msra.mxu1 %v1178_v35 }
 0x93e   : > { %v1255_v45 = vpop.permute.xlu0 %1254 }
 0x93f   : > { %v1265_v46 = vsel %vm592_vm3, %v2014_v51, %v1255_v45 }
 0x941   : > { %v1727_v36 = vpop.eup %1726 }
 0x942   : > { %v1176_v37 = vmul.f32 %v1727_v36, %v1725_v32  ;;  %v1259_v3 = vpop.permute.xlu0 %1258 }
 0x943   : > { %v1267_v47 = vsel %vm1266_vm4, %v1265_v46, %v1259_v3 }
 0x944   : > { %1617 = vmatmul.mubr.msk.f32.vlgmr.msra.gmra.mrb[16].mxu1 %vm592_vm3, %v1176_v37 }
 0xa17   : > { %v1249_v43 = vpop.f32.mrb[16].mxu1 }
 0xa18   : > { %1262 = vrot.lane.b32.xlu1 %v1249_v43, %s1802_s29  ;;  %v1618_v44 = vpop.f32.mrb[17].mxu1  ;;  %s1734_s29 = scalar_lea.vmem %s1733_s23, 256 }
 0xa19   : > { %p1736_p1 = scmp.lt.s32.totalorder %s1734_s29, %s1728_s22 }
 0xa1b   : > { %p1737_p2 = por %p1736_p1, %p1735_p0 }
 0xa1d   : > { %p1738_p3 = pnand %p1737_p2, %p1731_p13 }
 0xa8a   : > { %v1263_v48 = vpop.permute.xlu1 %1262 }
 0xa8b   : > { %v1269_v49 = vsel %vm1268_vm5, %v1267_v47, %v1263_v48 }
 0xa8c   : > { %1628 = vmatmul.mubr.msk.f32.vlgmr.msra.gmra.mrb[4].mxu0 %vm330_vm0, %v1269_v49 }
 0xb5f   : > { %v1362_v50 = vpop.f32.mrb[4].mxu0 }
 0xb60   : > { %v1363_v52 = vadd.f32 %v1500_v4, %v1362_v50  ;;  %v1629_v53 = vpop.f32.mrb[5].mxu0 }
 0xb62   : > { %1366 = vst.msk [vmem:[%s295_s15] sm:$0xff] %vm330_vm0, %v1363_v52 }
 0xb63   : > { %1741 = shalt.err (!%p1738_p3)
}
 0xb64   : > { %s1742_s8 = scalar_lea.hbm %s2078_s19, 128  ;;  %s1746_s13 = scalar_lea.hbm %s2128_s7, 256 }
 0xb65   : > { %p1743_p4 = scmp.ne.s32.totalorder %s2078_s19, %s1742_s8  ;;  %p1747_p9 = scmp.lt.u32.totalorder %s2078_s19, %s2128_s7 }
 0xb66   : > { %p1748_p10 = scmp.lt.u32.totalorder %s1746_s13, %s1742_s8  ;;  %p1750_p12 = scmp.lt.u32.totalorder %s1742_s8, %s2078_s19 }
 0xb67   : > { %p1744_p7 = pnand %p1743_p4, %p1882_p5 }
 0xb68   : > { %p1749_p11 = por %p1748_p10, %p1747_p9 }
 0xb69   : > { %p1745_p8 = pneg %p1744_p7 }
 0xb6a   : > { %p1751_p13 = por %p1750_p12, %p1749_p11 }
 0xb6c   : > { %p1752_p0 = pnand %p1751_p13, %p1745_p8 }
 0xb6e   : > { %1755 = shalt.err (!%p1752_p0)
}
 0xb6f   : > { %1662 = dma.vmem_to_hbm [thread:$0]  (%p1882_p5), %s2080_s16, 128, %s2078_s19, %s1368_s21  }
 0xb70 PF: > { %p1668_p1 = scmp.ge.s32.totalorder %s1790_s27, 2  ;;  %s1393_s17 = sand.u32 1, %s1778_s24  }
 0xb71   : > { %s1394_s18 = scalar_lea.sflag [#allocation3], %s1393_s17 }
 0xb72   : > { %p1665_p2 = pnand %p1668_p1, %p1886_p6 }
 0xb74   : > { %1773 = dma.done.wait (!%p1665_p2), %s1394_s18, 128  }
 0xb75   : > { %1775 = vsyncadd (!%p1665_p2), %s1394_s18, 4294967168  ;;  %p17_p3 = scmp.ge.s32.totalorder %s1869_s30, 4   ;;  %s2133_s24 = smov %s1782_s25 }
 0xb76   : > { %s2134_s25 = smov %s1786_s26  ;;  %s2135_s26 = smov %s1880_s10 }
 0xb77   : > { %s2136_s27 = smov %s1869_s30  ;;  %19 = sbr.rel (!%p17_p3) target bundleno = 3 (0x3), region = 89 }
 0xb7e   :  { %1399 = vsyncpa [#allocation3], 1 }
 0xb7f   :  { %1401 = vsyncpa [#allocation3 + $0x1], 1 }

</bundles_post_ra>
